<compile_context>
chip_gen: v6e
topology: v6e:2x2x1
jax: 0.10.0
libtpu: 0.0.40
codegen_flags: <defaults>
</compile_context>

<pallas_src>
import jax
import jax.numpy as jnp
from jax.experimental import pallas as pl
from jax.experimental.pallas import tpu as pltpu


def _round_up(a, b):
    return (a + b - 1) // b * b


def qnetwork_kernel(x_ref, w1_ref, b1_ref, w2_ref, b2_ref, w3_ref, b3_ref, o_ref):
    # Feature-major layout: x is (S, TB), weights are pre-transposed (out, in).
    # All matmul inputs bf16, accumulation f32 on the MXU; bias/ReLU f32 on the VPU.
    x = x_ref[...].astype(jnp.bfloat16)                                   # (S, TB)

    h1 = jnp.dot(w1_ref[...], x, preferred_element_type=jnp.float32) + b1_ref[...]
    h1 = jnp.maximum(h1, 0.0)                                             # (H, TB) f32

    h2 = jnp.dot(w2_ref[...], h1.astype(jnp.bfloat16),
                 preferred_element_type=jnp.float32) + b2_ref[...]
    h2 = jnp.maximum(h2, 0.0)                                             # (H, TB) f32

    out = jnp.dot(w3_ref[...], h2.astype(jnp.bfloat16),
                  preferred_element_type=jnp.float32) + b3_ref[...]
    o_ref[...] = out.astype(o_ref.dtype)                                  # (A_pad, TB)


def prepare_params(params):
    """One-time prep (per parameter update), hoisted out of the forward path:
    transpose weights to (out_features, in_features), pad the action dim to a
    sublane multiple of 8, reshape biases to column vectors, cast matmul inputs
    to bf16.  Biases stay f32."""
    w1, b1, w2, b2, w3, b3 = params
    A = w3.shape[1]
    A_pad = _round_up(A, 8)
    w1t = w1.T.astype(jnp.bfloat16)                                        # (H, S)
    w2t = w2.T.astype(jnp.bfloat16)                                        # (H, H)
    w3t = jnp.pad(w3, ((0, 0), (0, A_pad - A))).T.astype(jnp.bfloat16)     # (A_pad, H)
    b1t = b1.reshape(-1, 1).astype(jnp.float32)                            # (H, 1)
    b2t = b2.reshape(-1, 1).astype(jnp.float32)                            # (H, 1)
    b3t = jnp.pad(b3.reshape(-1), (0, A_pad - A)).reshape(-1, 1).astype(jnp.float32)
    return (w1t, b1t, w2t, b2t, w3t, b3t), A


def _choose_batch_tile(B, tb):
    """Batch lives on the lane axis -> tile must be a multiple of 128.
    Split moderate batches into >=2 grid steps so v7x's two TensorCores both work."""
    B128 = _round_up(B, 128)
    if B128 <= 128:
        TB = 128                      # can't go below one lane tile
    elif B128 <= 2 * tb:
        TB = _round_up(pl.cdiv(B128, 2), 128)
    else:
        TB = tb
    B_pad = _round_up(B128, TB)
    return TB, B_pad


def qnetwork_forward(x, prepared_params, action_dim, *, tb=1024):
    """x: [B, state_dim] f32.  prepared_params from prepare_params().
    Returns [B, action_dim] f32."""
    w1t, b1t, w2t, b2t, w3t, b3t = prepared_params
    B, S = x.shape
    H = w1t.shape[0]
    A_pad = w3t.shape[0]

    TB, B_pad = _choose_batch_tile(B, tb)
    grid = (B_pad // TB,)

    # Layout plumbing only: present activations feature-major (batch on lanes).
    x_t = jnp.pad(x, ((0, B_pad - B), (0, 0))).T                          # (S, B_pad) f32

    const = lambda shape: pl.BlockSpec(shape, lambda i: (0,) * len(shape))

    flops = 2 * B_pad * (S * H + H * H + H * A_pad)
    bytes_accessed = (
        x_t.size * 4
        + (w1t.size + w2t.size + w3t.size) * 2
        + (b1t.size + b2t.size + b3t.size) * 4
        + A_pad * B_pad * 4
    )

    out_t = pl.pallas_call(
        qnetwork_kernel,
        out_shape=jax.ShapeDtypeStruct((A_pad, B_pad), jnp.float32),
        grid=grid,
        in_specs=[
            pl.BlockSpec((S, TB), lambda i: (0, i)),   # activations: tiled over batch (lanes)
            const((H, S)),                             # weights / biases: VMEM-resident
            const((H, 1)),
            const((H, H)),
            const((H, 1)),
            const((A_pad, H)),
            const((A_pad, 1)),
        ],
        out_specs=pl.BlockSpec((A_pad, TB), lambda i: (0, i)),
        compiler_params=pltpu.CompilerParams(
            dimension_semantics=("parallel",),          # shard batch tiles across v7x's 2 TCs
            vmem_limit_bytes=32 * 1024 * 1024,
        ),
        cost_estimate=pl.CostEstimate(
            flops=flops, transcendentals=0, bytes_accessed=bytes_accessed
        ),
    )(x_t, w1t, b1t, w2t, b2t, w3t, b3t)

    return out_t[:action_dim, :B].T


def init_params(key, state_dim, action_dim, hidden=128):
    # PyTorch-style uniform(-1/sqrt(fan_in), 1/sqrt(fan_in)) init, f32 master weights.
    def linear(key, fan_in, fan_out):
        kw, kb = jax.random.split(key)
        bound = 1.0 / jnp.sqrt(fan_in)
        w = jax.random.uniform(kw, (fan_in, fan_out), jnp.float32, -bound, bound)
        b = jax.random.uniform(kb, (1, fan_out), jnp.float32, -bound, bound)
        return w, b

    k1, k2, k3 = jax.random.split(key, 3)
    w1, b1 = linear(k1, state_dim, hidden)
    w2, b2 = linear(k2, hidden, hidden)
    w3, b3 = linear(k3, hidden, action_dim)
    return (w1, b1, w2, b2, w3, b3)


def reference_forward(x, params):
    # Same dtype strategy as the kernel: bf16 matmul inputs, f32 accumulation/elementwise.
    w1, b1, w2, b2, w3, b3 = params
    bf = jnp.bfloat16
    h1 = jnp.maximum(
        jnp.dot(x.astype(bf), w1.astype(bf), preferred_element_type=jnp.float32) + b1, 0.0)
    h2 = jnp.maximum(
        jnp.dot(h1.astype(bf), w2.astype(bf), preferred_element_type=jnp.float32) + b2, 0.0)
    return jnp.dot(h2.astype(bf), w3.astype(bf), preferred_element_type=jnp.float32) + b3


if __name__ == "__main__":
    key = jax.random.PRNGKey(0)
    state_dim, action_dim, batch = 8, 4, 2

    kx, kp, kx2 = jax.random.split(key, 3)
    params = init_params(kp, state_dim, action_dim)
    prepared, A = prepare_params(params)          # hoisted weight cast/pad/transpose

    # Small RL-inference batch (single grid step).
    x = jax.random.normal(kx, (batch, state_dim), jnp.float32)
    out = qnetwork_forward(x, prepared, A)
    jax.block_until_ready(out)
    ref = reference_forward(x, params)
    assert out.shape == (batch, action_dim)
    assert jnp.allclose(out, ref, atol=1e-2, rtol=1e-2), (out, ref)

    # Larger replay-buffer batch: exercises the multi-tile grid path (>=2 steps).
    x2 = jax.random.normal(kx2, (300, state_dim), jnp.float32)
    out2 = qnetwork_forward(x2, prepared, A)
    jax.block_until_ready(out2)
    ref2 = reference_forward(x2, params)
    assert out2.shape == (300, action_dim)
    assert jnp.allclose(out2, ref2, atol=1e-2, rtol=1e-2)

    print("KERNEL_OK")
</pallas_src>

<mosaic_0001>
module attributes {stable_mosaic.version = 11 : i64} {
  func.func @qnetwork_kernel(%arg0: i32, %arg1: memref<8x128xf32, #tpu.memory_space<vmem>>, %arg2: memref<128x8xbf16, #tpu.memory_space<vmem>>, %arg3: memref<128x1xf32, #tpu.memory_space<vmem>>, %arg4: memref<128x128xbf16, #tpu.memory_space<vmem>>, %arg5: memref<128x1xf32, #tpu.memory_space<vmem>>, %arg6: memref<8x128xbf16, #tpu.memory_space<vmem>>, %arg7: memref<8x1xf32, #tpu.memory_space<vmem>>, %arg8: memref<8x128xf32, #tpu.memory_space<vmem>>) attributes {dimension_semantics = [#tpu.dimension_semantics<parallel>], iteration_bounds = array<i64: 1>, scalar_prefetch = 0 : i64, scratch_operands = 0 : i64, tpu.core_type = #tpu.core_type<tc>, window_params = [{transform_indices = @transform_0, window_bounds = array<i64: 8, 128>}, {pipeline_mode = #tpu.pipeline_mode<synchronous>, transform_indices = @transform_1, window_bounds = array<i64: 128, 8>}, {pipeline_mode = #tpu.pipeline_mode<synchronous>, transform_indices = @transform_2, window_bounds = array<i64: 128, 1>}, {pipeline_mode = #tpu.pipeline_mode<synchronous>, transform_indices = @transform_3, window_bounds = array<i64: 128, 128>}, {pipeline_mode = #tpu.pipeline_mode<synchronous>, transform_indices = @transform_4, window_bounds = array<i64: 128, 1>}, {pipeline_mode = #tpu.pipeline_mode<synchronous>, transform_indices = @transform_5, window_bounds = array<i64: 8, 128>}, {pipeline_mode = #tpu.pipeline_mode<synchronous>, transform_indices = @transform_6, window_bounds = array<i64: 8, 1>}, {transform_indices = @transform_7, window_bounds = array<i64: 8, 128>}]} {
    %c0 = arith.constant 0 : index
    %c0_0 = arith.constant 0 : index
    %0 = vector.load %arg1[%c0, %c0_0] : memref<8x128xf32, #tpu.memory_space<vmem>>, vector<8x128xf32>
    %1 = arith.truncf %0 : vector<8x128xf32> to vector<8x128xbf16>
    %c0_1 = arith.constant 0 : index
    %c0_2 = arith.constant 0 : index
    %2 = vector.load %arg2[%c0_1, %c0_2] : memref<128x8xbf16, #tpu.memory_space<vmem>>, vector<128x8xbf16>
    %cst = arith.constant dense<0.000000e+00> : vector<128x128xf32>
    %3 = tpu.matmul %2, %1, %cst {dimension_numbers = #tpu.dot_dimension_numbers<[1], [0], [0], [1], [0, 0, 1, 1], [], []>} : vector<128x8xbf16>, vector<8x128xbf16>, vector<128x128xf32> -> vector<128x128xf32>
    %c0_3 = arith.constant 0 : index
    %c0_4 = arith.constant 0 : index
    %4 = vector.load %arg3[%c0_3, %c0_4] : memref<128x1xf32, #tpu.memory_space<vmem>>, vector<128x1xf32>
    %5 = vector.broadcast %4 : vector<128x1xf32> to vector<128x128xf32>
    %6 = arith.addf %3, %5 : vector<128x128xf32>
    %cst_5 = arith.constant 0.000000e+00 : f32
    %7 = vector.broadcast %cst_5 : f32 to vector<128x128xf32>
    %8 = arith.maximumf %6, %7 : vector<128x128xf32>
    %c0_6 = arith.constant 0 : index
    %c0_7 = arith.constant 0 : index
    %9 = vector.load %arg4[%c0_6, %c0_7] : memref<128x128xbf16, #tpu.memory_space<vmem>>, vector<128x128xbf16>
    %10 = arith.truncf %8 : vector<128x128xf32> to vector<128x128xbf16>
    %cst_8 = arith.constant dense<0.000000e+00> : vector<128x128xf32>
    %11 = tpu.matmul %9, %10, %cst_8 {dimension_numbers = #tpu.dot_dimension_numbers<[1], [0], [0], [1], [0, 0, 1, 1], [], []>} : vector<128x128xbf16>, vector<128x128xbf16>, vector<128x128xf32> -> vector<128x128xf32>
    %c0_9 = arith.constant 0 : index
    %c0_10 = arith.constant 0 : index
    %12 = vector.load %arg5[%c0_9, %c0_10] : memref<128x1xf32, #tpu.memory_space<vmem>>, vector<128x1xf32>
    %13 = vector.broadcast %12 : vector<128x1xf32> to vector<128x128xf32>
    %14 = arith.addf %11, %13 : vector<128x128xf32>
    %cst_11 = arith.constant 0.000000e+00 : f32
    %15 = vector.broadcast %cst_11 : f32 to vector<128x128xf32>
    %16 = arith.maximumf %14, %15 : vector<128x128xf32>
    %c0_12 = arith.constant 0 : index
    %c0_13 = arith.constant 0 : index
    %17 = vector.load %arg6[%c0_12, %c0_13] : memref<8x128xbf16, #tpu.memory_space<vmem>>, vector<8x128xbf16>
    %18 = arith.truncf %16 : vector<128x128xf32> to vector<128x128xbf16>
    %cst_14 = arith.constant dense<0.000000e+00> : vector<8x128xf32>
    %19 = tpu.matmul %17, %18, %cst_14 {dimension_numbers = #tpu.dot_dimension_numbers<[1], [0], [0], [1], [0, 0, 1, 1], [], []>} : vector<8x128xbf16>, vector<128x128xbf16>, vector<8x128xf32> -> vector<8x128xf32>
    %c0_15 = arith.constant 0 : index
    %c0_16 = arith.constant 0 : index
    %20 = vector.load %arg7[%c0_15, %c0_16] : memref<8x1xf32, #tpu.memory_space<vmem>>, vector<8x1xf32>
    %21 = vector.broadcast %20 : vector<8x1xf32> to vector<8x128xf32>
    %22 = arith.addf %19, %21 : vector<8x128xf32>
    %c0_17 = arith.constant 0 : index
    %c0_18 = arith.constant 0 : index
    %23 = vector.load %arg8[%c0_17, %c0_18] : memref<8x128xf32, #tpu.memory_space<vmem>>, vector<8x128xf32>
    tpu.vector_store %arg8[%c0_17, %c0_18], %22 {strides = array<i32>} : memref<8x128xf32, #tpu.memory_space<vmem>>, vector<8x128xf32>,
    return
  }
  func.func @transform_0(%arg0: i32) -> (i32, i32) {
    %c0_i32 = arith.constant 0 : i32
    %c0_i32_0 = arith.constant 0 : i32
    return %c0_i32, %arg0 : i32, i32
  }
  func.func @transform_1(%arg0: i32) -> (i32, i32) {
    %c0_i32 = arith.constant 0 : i32
    %c0_i32_0 = arith.constant 0 : i32
    %c0_i32_1 = arith.constant 0 : i32
    return %c0_i32, %c0_i32_0 : i32, i32
  }
  func.func @transform_2(%arg0: i32) -> (i32, i32) {
    %c0_i32 = arith.constant 0 : i32
    %c0_i32_0 = arith.constant 0 : i32
    %c0_i32_1 = arith.constant 0 : i32
    return %c0_i32, %c0_i32_0 : i32, i32
  }
  func.func @transform_3(%arg0: i32) -> (i32, i32) {
    %c0_i32 = arith.constant 0 : i32
    %c0_i32_0 = arith.constant 0 : i32
    %c0_i32_1 = arith.constant 0 : i32
    return %c0_i32, %c0_i32_0 : i32, i32
  }
  func.func @transform_4(%arg0: i32) -> (i32, i32) {
    %c0_i32 = arith.constant 0 : i32
    %c0_i32_0 = arith.constant 0 : i32
    %c0_i32_1 = arith.constant 0 : i32
    return %c0_i32, %c0_i32_0 : i32, i32
  }
  func.func @transform_5(%arg0: i32) -> (i32, i32) {
    %c0_i32 = arith.constant 0 : i32
    %c0_i32_0 = arith.constant 0 : i32
    %c0_i32_1 = arith.constant 0 : i32
    return %c0_i32, %c0_i32_0 : i32, i32
  }
  func.func @transform_6(%arg0: i32) -> (i32, i32) {
    %c0_i32 = arith.constant 0 : i32
    %c0_i32_0 = arith.constant 0 : i32
    %c0_i32_1 = arith.constant 0 : i32
    return %c0_i32, %c0_i32_0 : i32, i32
  }
  func.func @transform_7(%arg0: i32) -> (i32, i32) {
    %c0_i32 = arith.constant 0 : i32
    %c0_i32_0 = arith.constant 0 : i32
    return %c0_i32, %arg0 : i32, i32
  }
}

</mosaic_0001>

<bundles_post_ra>
// kernel: tpu_custom_call.1
= control target key start
LH: loop header
LB: loop body
LE: loop exit
PB: predicated region body
PF: predicated region fallthrough
CT: control target
= control target key end

     0   :  { %vm207_vm0 = vcmask 1043456   ;;  %vm182_vm1 = vcmask 64512   ;;  %v848_v6 = vmov 0   ;;  %s1083_s0 = inlined_call_operand.vmem [shape: f32[8,128], index: 0, kind: input, shape index: {}]   ;;  %s1084_s1 = inlined_call_operand.vmem [shape: bf16[128,8], index: 1, kind: input, shape index: {}]   ;;  %s1085_s2 = inlined_call_operand.vmem [shape: f32[128,1], index: 2, kind: input, shape index: {}]   ;;  %s1086_s3 = inlined_call_operand.vmem [shape: bf16[128,128], index: 3, kind: input, shape index: {}]   ;;  %s1087_s4 = inlined_call_operand.vmem [shape: f32[128,1], index: 4, kind: input, shape index: {}]   ;;  %s1088_s5 = inlined_call_operand.vmem [shape: bf16[8,128], index: 5, kind: input, shape index: {}]   ;;  %s1089_s6 = inlined_call_operand.vmem [shape: f32[8,1], index: 6, kind: input, shape index: {}]   ;;  %s1090_s7 = inlined_call_operand.hbm [shape: f32[8,128], index: 7, kind: output, shape index: {}]  }
   0x1   :  { %v28_v0 = vld [vmem:[%s1083_s0] sm:$0xff]  ;;  %v811_v4 = vld [vmem:[%s1084_s1 + $0x8] sm:$0xff]   ;;  %v812_v5 = vld [vmem:[%s1084_s1 + $0x10] sm:$0xff]   ;;  %808 = vset.pattern.permute.xlu0 %v848_v6  ;;  %809 = vset.pattern.permute.xlu1 %v848_v6 }
   0x2   :  { %v29_v1 = vpack.c.bf16 %v28_v0, %v28_v0  ;;  %v810_v2 = vld [vmem:[%s1084_s1] sm:$0xff]   ;;  %v60_v7 = vld [vmem:[%s1085_s2 + $0x70] sm:$0xff]  ;;  %v61_v9 = vld [vmem:[%s1085_s2 + $0x78] sm:$0xff] }
   0x3   :  { %735 = vmatprep.mubr.msk.bf16.mxu0 %vm182_vm1, %v810_v2  ;;  %134 = vperm.xlu0 %808, %v60_v7   ;;  %v58_v8 = vld [vmem:[%s1085_s2 + $0x60] sm:$0xff]  ;;  %v813_v10 = vld [vmem:[%s1084_s1 + $0x18] sm:$0xff]   ;;  %v59_v11 = vld [vmem:[%s1085_s2 + $0x68] sm:$0xff] }
   0x4   :  { %803 = vmatprep.subr.msk.bf16.mxu0 %vm207_vm0, %v29_v1  ;;  %v209_v3 = vsel %vm207_vm0, %v29_v1, 0  ;;  %124 = vperm.xlu1 %809, %v58_v8   ;;  %v814_v12 = vld [vmem:[%s1084_s1 + $0x20] sm:$0xff]   ;;  %v56_v13 = vld [vmem:[%s1085_s2 + $0x50] sm:$0xff]  ;;  %v57_v14 = vld [vmem:[%s1085_s2 + $0x58] sm:$0xff] }
   0x5   :  { %734 = vmatpush3.bf16.msra.mxu0 %v209_v3  ;;  %v815_v15 = vld [vmem:[%s1084_s1 + $0x28] sm:$0xff]   ;;  %v816_v16 = vld [vmem:[%s1084_s1 + $0x30] sm:$0xff]   ;;  %v54_v17 = vld [vmem:[%s1085_s2 + $0x40] sm:$0xff] }
   0x6   :  { %v55_v18 = vld [vmem:[%s1085_s2 + $0x48] sm:$0xff]  ;;  %v52_v19 = vld [vmem:[%s1085_s2 + $0x30] sm:$0xff]  ;;  %v53_v20 = vld [vmem:[%s1085_s2 + $0x38] sm:$0xff] }
   0x7   :  { %139 = vperm.xlu0 %808, %v61_v9  }
   0x8   :  { %736 = vmatmul.mubr.msk.bf16.vlgmr.msra.gmra.mxu0 %vm182_vm1, %v811_v4  ;;  %129 = vperm.xlu1 %809, %v59_v11  }
   0x9   :  { %739 = vmatprep.mubr.msk.bf16.mxu0 %vm182_vm1, %v812_v5 }
   0xb   :  { %114 = vperm.xlu0 %808, %v56_v13  }
   0xc   :  { %119 = vperm.xlu1 %809, %v57_v14  }
   0xf   :  { %104 = vperm.xlu0 %808, %v54_v17  }
  0x10   :  { %740 = vmatmul.mubr.msk.bf16.gmra.mxu0 %vm182_vm1, %v813_v10  ;;  %109 = vperm.xlu1 %809, %v55_v18  }
  0x11   :  { %743 = vmatprep.mubr.msk.bf16.mxu0 %vm182_vm1, %v814_v12 }
  0x18   :  { %744 = vmatmul.mubr.msk.bf16.gmra.mxu0 %vm182_vm1, %v815_v15 }
  0x19   :  { %747 = vmatprep.mubr.msk.bf16.mxu0 %vm182_vm1, %v816_v16 }
  0x1a   :  { %12 = vsyncpa [#allocation3], 0  ;;  %94 = vperm.xlu0 %808, %v52_v19   ;;  %v50_v21 = vld [vmem:[%s1085_s2 + $0x20] sm:$0xff]  ;;  %99 = vperm.xlu1 %809, %v53_v20   ;;  %v817_v22 = vld [vmem:[%s1084_s1 + $0x38] sm:$0xff]   ;;  %vm850_vm2 = vmmov 0   ;;  %s851_s23 = smov [#allocation2]  }
  0x1b   :  { %v51_v23 = vld [vmem:[%s1085_s2 + $0x28] sm:$0xff]  ;;  %v48_v24 = vld [vmem:[%s1085_s2 + $0x10] sm:$0xff]  ;;  %v49_v25 = vld [vmem:[%s1085_s2 + $0x18] sm:$0xff]  ;;  %s667_s1 = sshll.u32 %s851_s23, 4  ;;  %s668_s1 = int_to_ptr.vmem [resolvable:$true] %s667_s1 }
  0x1c   :  { %v46_v26 = vld [vmem:[%s1085_s2] sm:$0xff]  ;;  %v47_v27 = vld [vmem:[%s1085_s2 + $0x8] sm:$0xff]  ;;  %v362_v28 = vld [vmem:[%s1087_s4 + $0x70] sm:$0xff]  ;;  %s826_s24 = scalar_lea.vmem %s668_s1, 128  ;;  %p831_p1 = scmp.lt.s32.totalorder %s668_s1, %s668_s1 }
  0x1d   :  { %v363_v29 = vld [vmem:[%s1087_s4 + $0x78] sm:$0xff]  ;;  %v360_v30 = vld [vmem:[%s1087_s4 + $0x60] sm:$0xff]  ;;  %v361_v31 = vld [vmem:[%s1087_s4 + $0x68] sm:$0xff]  ;;  %p827_p0 = scmp.ne.s32.totalorder %s668_s1, %s826_s24  ;;  %p832_p2 = scmp.lt.s32.totalorder %s826_s24, %s826_s24 }
  0x1e   :  { %84 = vperm.xlu0 %808, %v50_v21   ;;  %89 = vperm.xlu1 %809, %v51_v23   ;;  %v358_v32 = vld [vmem:[%s1087_s4 + $0x50] sm:$0xff]  ;;  %v359_v33 = vld [vmem:[%s1087_s4 + $0x58] sm:$0xff]  ;;  %v356_v34 = vld [vmem:[%s1087_s4 + $0x40] sm:$0xff] }
  0x1f   :  { %v357_v35 = vld [vmem:[%s1087_s4 + $0x48] sm:$0xff]  ;;  %v354_v36 = vld [vmem:[%s1087_s4 + $0x30] sm:$0xff]  ;;  %v355_v37 = vld [vmem:[%s1087_s4 + $0x38] sm:$0xff]  ;;  %p833_p3 = por %p832_p2, %p831_p1 }
  0x20   :  { %748 = vmatmul.mubr.msk.bf16.gmra.mxu0 %vm182_vm1, %v817_v22  ;;  %v352_v38 = vld [vmem:[%s1087_s4 + $0x20] sm:$0xff]  ;;  %v353_v39 = vld [vmem:[%s1087_s4 + $0x28] sm:$0xff]  ;;  %v350_v40 = vld [vmem:[%s1087_s4 + $0x10] sm:$0xff] }
  0x21   :  { %v351_v41 = vld [vmem:[%s1087_s4 + $0x18] sm:$0xff]  ;;  %v348_v42 = vld [vmem:[%s1087_s4] sm:$0xff]  ;;  %v349_v43 = vld [vmem:[%s1087_s4 + $0x8] sm:$0xff]  ;;  %p834_p4 = pnand %p833_p3, %p827_p0 }
  0x22   :  { %74 = vperm.xlu0 %808, %v48_v24   ;;  %79 = vperm.xlu1 %809, %v49_v25   ;;  %v614_v44 = vld [vmem:[%s1089_s6] sm:$0xff] }
  0x23   :  { %v818_v45 = vld [vmem:[%s1086_s3] sm:$0xff]  }
  0x24   :  { %767 = vmatprep.mubr.bf16.mxu1 %v818_v45 }
  0x26   :  { %64 = vperm.xlu0 %808, %v46_v26   ;;  %69 = vperm.xlu1 %809, %v47_v27  }
  0x2a   :  { %436 = vperm.xlu0 %808, %v362_v28   ;;  %441 = vperm.xlu1 %809, %v363_v29  }
  0x2e   :  { %426 = vperm.xlu0 %808, %v360_v30   ;;  %431 = vperm.xlu1 %809, %v361_v31  }
  0x32   :  { %416 = vperm.xlu0 %808, %v358_v32   ;;  %421 = vperm.xlu1 %809, %v359_v33  }
  0x36   :  { %406 = vperm.xlu0 %808, %v356_v34   ;;  %411 = vperm.xlu1 %809, %v357_v35  }
  0x3a   :  { %396 = vperm.xlu0 %808, %v354_v36   ;;  %401 = vperm.xlu1 %809, %v355_v37  }
  0x3e   :  { %386 = vperm.xlu0 %808, %v352_v38   ;;  %391 = vperm.xlu1 %809, %v353_v39  }
  0x42   :  { %376 = vperm.xlu0 %808, %v350_v40   ;;  %381 = vperm.xlu1 %809, %v351_v41  }
  0x46   :  { %366 = vperm.xlu0 %808, %v348_v42   ;;  %371 = vperm.xlu1 %809, %v349_v43  }
  0x4a   :  { %617 = vperm.xlu0 %808, %v614_v44  }
  0x7e   :  { %v135_v52 = vpop.permute.xlu0 %134 }
  0x7f   :  { %v125_v50 = vpop.permute.xlu1 %124 }
  0x82   :  { %v140_v57 = vpop.permute.xlu0 %139 }
  0x83   :  { %v130_v55 = vpop.permute.xlu1 %129 }
  0x86   :  { %v115_v62 = vpop.permute.xlu0 %114 }
  0x87   :  { %v120_v60 = vpop.permute.xlu1 %119 }
  0x8a   :  { %v105_v4 = vpop.permute.xlu0 %104 }
  0x8b   :  { %v110_v1 = vpop.permute.xlu1 %109 }
  0x95   :  { %v100_v13 = vpop.permute.xlu1 %99  ;;  %v95_v18 = vpop.permute.xlu0 %94 }
  0x99   :  { %v90_v24 = vpop.permute.xlu1 %89  ;;  %v85_v28 = vpop.permute.xlu0 %84 }
  0x9d   :  { %v80_v34 = vpop.permute.xlu1 %79  ;;  %v75_v37 = vpop.permute.xlu0 %74 }
  0xa1   :  { %v70_v43 = vpop.permute.xlu1 %69 }
  0xc8   :  { %v1029_v46 = vpop.f32.mrf.mxu0 }
  0xc9   :  { %v254_v41 = vadd.f32 %v1029_v46, %v75_v37  ;;  %v819_v46 = vld [vmem:[%s1086_s3 + $0x8] sm:$0xff]  }
  0xca   :  { %v1031_v47 = vpop.f32.mrf.mxu0 }
  0xcc   :  { %v738_v48 = vpop.f32.mrf.mxu0 }
  0xcd   :  { %v257_v38 = vadd.f32 %v738_v48, %v80_v34 }
  0xce   :  { %v1033_v49 = vpop.f32.mrf.mxu0 }
  0xcf   :  { %v311_v44 = vmax.f32 %v257_v38, 0.0  ;;  %v249_v45 = vadd.f32 %v1033_v49, %v70_v43  ;;  %v820_v49 = vld [vmem:[%s1086_s3 + $0x10] sm:$0xff]  }
  0xd0   :  { %v741_v51 = vpop.f32.mrf.mxu0 }
  0xd1   :  { %v270_v29 = vadd.f32 %v741_v51, %v95_v18  ;;  %v65_v51 = vpop.permute.xlu0 %64  ;;  %v309_v48 = vmax.f32 %v249_v45, 0.0 }
  0xd2   :  { %v261_v53 = vpop.f32.mrf.mxu0 }
  0xd3   :  { %v314_v35 = vmax.f32 %v270_v29, 0.0  ;;  %v262_v36 = vadd.f32 %v261_v53, %v85_v28  ;;  %v246_v53 = vadd.f32 %v1031_v47, %v65_v51  ;;  %v821_v47 = vld [vmem:[%s1086_s3 + $0x18] sm:$0xff]  }
  0xd4   :  { %v742_v54 = vpop.f32.mrf.mxu0 }
  0xd5   :  { %v273_v25 = vadd.f32 %v742_v54, %v100_v13  ;;  %v312_v42 = vmax.f32 %v262_v36, 0.0 }
  0xd6   :  { %v264_v56 = vpop.f32.mrf.mxu0 }
  0xd7   :  { %v315_v31 = vmax.f32 %v273_v25, 0.0  ;;  %v265_v32 = vadd.f32 %v264_v56, %v90_v24 }
  0xd8   :  { %v745_v58 = vpop.f32.mrf.mxu0 }
  0xd9   :  { %v286_v14 = vadd.f32 %v745_v58, %v115_v62  ;;  %v343_v39 = vpack.c.bf16 %v315_v31, %v314_v35  ;;  %v313_v40 = vmax.f32 %v265_v32, 0.0  ;;  %v823_v58 = vld [vmem:[%s1086_s3 + $0x28] sm:$0xff]  }
  0xda   :  { %v277_v59 = vpop.f32.mrf.mxu0 }
  0xdb   :  { %v318_v22 = vmax.f32 %v286_v14, 0.0  ;;  %v278_v23 = vadd.f32 %v277_v59, %v105_v4  ;;  %v824_v59 = vld [vmem:[%s1086_s3 + $0x30] sm:$0xff]  }
  0xdc   :  { %v746_v61 = vpop.f32.mrf.mxu0 }
  0xdd   :  { %v289_v9 = vadd.f32 %v746_v61, %v120_v60  ;;  %v316_v30 = vmax.f32 %v278_v23, 0.0  ;;  %v825_v60 = vld [vmem:[%s1086_s3 + $0x38] sm:$0xff]   ;;  %v849_v61 = vmov 0.0  }
  0xde   :  { %v280_v63 = vpop.f32.mrf.mxu0  ;;  %783 = vmatprep.subr.bf16.mxu0 %v849_v61  ;;  %799 = vmatprep.mubr.msk.bf16.mxu0 %vm850_vm2, %v849_v61 }
  0xdf   :  { %v319_v19 = vmax.f32 %v289_v9, 0.0  ;;  %v281_v20 = vadd.f32 %v280_v63, %v110_v1 }
  0xe0   :  { %v749_v0 = vpop.f32.mrf.mxu0 }
  0xe1   :  { %v302_v3 = vadd.f32 %v749_v0, %v135_v52  ;;  %v345_v26 = vpack.c.bf16 %v319_v19, %v318_v22  ;;  %v317_v27 = vmax.f32 %v281_v20, 0.0  ;;  %v310_v52 = vmax.f32 %v254_v41, 0.0 }
  0xe2   :  { %v293_v2 = vpop.f32.mrf.mxu0 }
  0xe3   :  { %v294_v6 = vadd.f32 %v293_v2, %v125_v50  ;;  %v322_v10 = vmax.f32 %v302_v3, 0.0  ;;  %v344_v33 = vpack.c.bf16 %v317_v27, %v316_v30  ;;  %v342_v50 = vpack.c.bf16 %v313_v40, %v312_v42  ;;  %v442_v3 = vpop.permute.xlu1 %441 }
  0xe4   :  { %v750_v5 = vpop.f32.mrf.mxu0  ;;  %v341_v54 = vpack.c.bf16 %v311_v44, %v310_v52 }
  0xe5   :  { %v305_v7 = vadd.f32 %v750_v5, %v140_v57  ;;  %v320_v15 = vmax.f32 %v294_v6, 0.0  ;;  %v822_v57 = vld [vmem:[%s1086_s3 + $0x20] sm:$0xff]   ;;  %v437_v5 = vpop.permute.xlu0 %436 }
  0xe6   :  { %v296_v8 = vpop.f32.mrf.mxu0 }
  0xe7   :  { %v323_v11 = vmax.f32 %v305_v7, 0.0  ;;  %v297_v12 = vadd.f32 %v296_v8, %v130_v55  ;;  %v308_v55 = vmax.f32 %v246_v53, 0.0  ;;  %v432_v8 = vpop.permute.xlu1 %431 }
  0xe9   :  { %v321_v16 = vmax.f32 %v297_v12, 0.0  ;;  %v347_v17 = vpack.c.bf16 %v323_v11, %v322_v10  ;;  %v340_v56 = vpack.c.bf16 %v309_v48, %v308_v55  ;;  %v427_v10 = vpop.permute.xlu0 %426 }
  0xeb   :  { %v346_v21 = vpack.c.bf16 %v321_v16, %v320_v15  ;;  %751 = vmatprep.subr.bf16.mxu1 %v347_v17  ;;  %v422_v13 = vpop.permute.xlu1 %421 }
  0xec   :  { %752 = vmatpush3.bf16.msra.mxu1 %v347_v17 }
  0xed   :  { %753 = vmatprep.subr.bf16.mxu1 %v346_v21  ;;  %v417_v15 = vpop.permute.xlu0 %416 }
  0xef   :  { %v412_v19 = vpop.permute.xlu1 %411 }
  0xf0   :  { %754 = vmatpush3.bf16.msra.mxu1 %v346_v21 }
  0xf1   :  { %755 = vmatprep.subr.bf16.mxu1 %v345_v26  ;;  %v407_v22 = vpop.permute.xlu0 %406 }
  0xf3   :  { %v402_v31 = vpop.permute.xlu1 %401 }
  0xf4   :  { %756 = vmatpush3.bf16.msra.mxu1 %v345_v26 }
  0xf5   :  { %757 = vmatprep.subr.bf16.mxu1 %v344_v33  ;;  %v397_v34 = vpop.permute.xlu0 %396 }
  0xf7   :  { %v392_v40 = vpop.permute.xlu1 %391 }
  0xf8   :  { %758 = vmatpush3.bf16.msra.mxu1 %v344_v33 }
  0xf9   :  { %759 = vmatprep.subr.bf16.mxu1 %v343_v39  ;;  %v387_v44 = vpop.permute.xlu0 %386 }
  0xfc   :  { %760 = vmatpush3.bf16.msra.mxu1 %v343_v39 }
  0xfd   :  { %761 = vmatprep.subr.bf16.mxu1 %v342_v50 }
 0x100   :  { %762 = vmatpush3.bf16.msra.mxu1 %v342_v50 }
 0x101   :  { %763 = vmatprep.subr.bf16.mxu1 %v341_v54 }
 0x104   :  { %764 = vmatpush3.bf16.msra.mxu1 %v341_v54  ;;  %v382_v54 = vpop.permute.xlu1 %381 }
 0x105   :  { %765 = vmatprep.subr.bf16.mxu1 %v340_v56 }
 0x108   :  { %766 = vmatpush3.bf16.msra.mxu1 %v340_v56  ;;  %v377_v56 = vpop.permute.xlu0 %376 }
 0x10b   :  { %768 = vmatmul.mubr.bf16.vlgmr.msra.gmra.mxu1 %v819_v46 }
 0x10c   :  { %771 = vmatprep.mubr.bf16.mxu1 %v820_v49 }
 0x113   :  { %772 = vmatmul.mubr.bf16.gmra.mxu1 %v821_v47 }
 0x114   :  { %775 = vmatprep.mubr.bf16.mxu1 %v822_v57 }
 0x11b   :  { %776 = vmatmul.mubr.bf16.gmra.mxu1 %v823_v58 }
 0x11c   :  { %779 = vmatprep.mubr.bf16.mxu1 %v824_v59  ;;  %v372_v59 = vpop.permute.xlu1 %371 }
 0x123   :  { %780 = vmatmul.mubr.bf16.gmra.mxu1 %v825_v60 }
 0x1cb   :  { %v1061_v62 = vpop.f32.mrf.mxu1 }
 0x1cc   :  { %v535_v57 = vadd.f32 %v1061_v62, %v377_v56 }
 0x1cd   :  { %v1063_v63 = vpop.f32.mrf.mxu1 }
 0x1cf   :  { %v770_v0 = vpop.f32.mrf.mxu1 }
 0x1d0   :  { %v538_v46 = vadd.f32 %v770_v0, %v382_v54 }
 0x1d1   :  { %v1065_v1 = vpop.f32.mrf.mxu1 }
 0x1d2   :  { %v592_v60 = vmax.f32 %v538_v46, 0.0 }
 0x1d3   :  { %v773_v2 = vpop.f32.mrf.mxu1 }
 0x1d4   :  { %v551_v45 = vadd.f32 %v773_v2, %v397_v34  ;;  %v530_v2 = vadd.f32 %v1065_v1, %v372_v59  ;;  %v605_v1 = vld [vmem:[%s1088_s5] sm:$0xf] }
 0x1d5   :  { %v542_v4 = vpop.f32.mrf.mxu1 }
 0x1d6   :  { %v595_v48 = vmax.f32 %v551_v45, 0.0  ;;  %v543_v55 = vadd.f32 %v542_v4, %v387_v44  ;;  %v591_v4 = vmax.f32 %v535_v57, 0.0 }
 0x1d7   :  { %v774_v6 = vpop.f32.mrf.mxu1 }
 0x1d8   :  { %v554_v41 = vadd.f32 %v774_v6, %v402_v31  ;;  %v593_v58 = vmax.f32 %v543_v55, 0.0  ;;  %v607_v0 = vpack.c.bf16 %v592_v60, %v591_v4 }
 0x1d9   :  { %v545_v7 = vpop.f32.mrf.mxu1 }
 0x1da   :  { %v596_v51 = vmax.f32 %v554_v41, 0.0  ;;  %v546_v52 = vadd.f32 %v545_v7, %v392_v40  ;;  %v590_v7 = vmax.f32 %v530_v2, 0.0 }
 0x1db   :  { %v777_v9 = vpop.f32.mrf.mxu1 }
 0x1dc   :  { %v567_v32 = vadd.f32 %v777_v9, %v417_v15  ;;  %v609_v49 = vpack.c.bf16 %v596_v51, %v595_v48  ;;  %v594_v47 = vmax.f32 %v546_v52, 0.0 }
 0x1dd   :  { %v558_v11 = vpop.f32.mrf.mxu1 }
 0x1de   :  { %v599_v38 = vmax.f32 %v567_v32, 0.0  ;;  %v559_v39 = vadd.f32 %v558_v11, %v407_v22 }
 0x1df   :  { %v778_v12 = vpop.f32.mrf.mxu1 }
 0x1e0   :  { %v570_v28 = vadd.f32 %v778_v12, %v422_v13  ;;  %v597_v50 = vmax.f32 %v559_v39, 0.0 }
 0x1e1   :  { %v561_v14 = vpop.f32.mrf.mxu1 }
 0x1e2   :  { %v600_v35 = vmax.f32 %v570_v28, 0.0  ;;  %v562_v36 = vadd.f32 %v561_v14, %v412_v19 }
 0x1e3   :  { %v781_v16 = vpop.f32.mrf.mxu1 }
 0x1e4   :  { %v583_v18 = vadd.f32 %v781_v16, %v437_v5  ;;  %v611_v42 = vpack.c.bf16 %v600_v35, %v599_v38  ;;  %v598_v43 = vmax.f32 %v562_v36, 0.0  ;;  %v367_v5 = vpop.permute.xlu0 %366 }
 0x1e5   :  { %v574_v17 = vpop.f32.mrf.mxu1  ;;  %v527_v6 = vadd.f32 %v1063_v63, %v367_v5 }
 0x1e6   :  { %v603_v24 = vmax.f32 %v583_v18, 0.0  ;;  %v575_v25 = vadd.f32 %v574_v17, %v427_v10  ;;  %v610_v53 = vpack.c.bf16 %v598_v43, %v597_v50 }
 0x1e7   :  { %v782_v20 = vpop.f32.mrf.mxu1 }
 0x1e8   :  { %v586_v21 = vadd.f32 %v782_v20, %v442_v3  ;;  %v601_v33 = vmax.f32 %v575_v25, 0.0  ;;  %v608_v3 = vpack.c.bf16 %v594_v47, %v593_v58  ;;  %v618_v9 = vpop.permute.xlu0 %617 }
 0x1e9   :  { %v577_v23 = vpop.f32.mrf.mxu1 }
 0x1ea   :  { %v604_v26 = vmax.f32 %v586_v21, 0.0  ;;  %v578_v27 = vadd.f32 %v577_v23, %v432_v8  ;;  %v589_v8 = vmax.f32 %v527_v6, 0.0 }
 0x1ec   :  { %v613_v29 = vpack.c.bf16 %v604_v26, %v603_v24  ;;  %v602_v30 = vmax.f32 %v578_v27, 0.0  ;;  %v606_v62 = vpack.c.bf16 %v590_v7, %v589_v8 }
 0x1ee   :  { %784 = vmatpush3.bf16.msra.mxu0 %v613_v29  ;;  %v612_v37 = vpack.c.bf16 %v602_v30, %v601_v33 }
 0x1ef   :  { %785 = vmatprep.subr.bf16.mxu0 %v849_v61 }
 0x1f2   :  { %786 = vmatpush3.bf16.msra.mxu0 %v612_v37 }
 0x1f3   :  { %787 = vmatprep.subr.bf16.mxu0 %v849_v61 }
 0x1f6   :  { %788 = vmatpush3.bf16.msra.mxu0 %v611_v42 }
 0x1f7   :  { %789 = vmatprep.subr.bf16.mxu0 %v849_v61 }
 0x1fa   :  { %790 = vmatpush3.bf16.msra.mxu0 %v610_v53 }
 0x1fb   :  { %791 = vmatprep.subr.bf16.mxu0 %v849_v61 }
 0x1fe   :  { %792 = vmatpush3.bf16.msra.mxu0 %v609_v49 }
 0x1ff   :  { %793 = vmatprep.subr.bf16.mxu0 %v849_v61 }
 0x202   :  { %794 = vmatpush3.bf16.msra.mxu0 %v608_v3 }
 0x203   :  { %795 = vmatprep.subr.bf16.mxu0 %v849_v61 }
 0x206   :  { %796 = vmatpush3.bf16.msra.mxu0 %v607_v0 }
 0x207   :  { %797 = vmatprep.subr.bf16.mxu0 %v849_v61 }
 0x20a   :  { %798 = vmatpush3.bf16.msra.mxu0 %v606_v62 }
 0x20d   :  { %800 = vmatmul.mubr.bf16.vlgmr.msra.gmra.mxu0 %v605_v1 }
 0x2cd   :  { %v654_v63 = vpop.f32.mrf.mxu0 }
 0x2ce   :  { %v655_v10 = vadd.f32 %v654_v63, %v618_v9 }
 0x2cf   :  { %v801_v11 = vpop.f32.mrf.mxu0 }
 0x2d0   :  { %660 = vst [vmem:[#allocation2] sm:$0xff] %v655_v10 }
 0x2d1   :  { %v657_v12 = vpop.f32.mrf.mxu0 }
 0x2d2   :  { %837 = shalt.err (!%p834_p4)
}
 0x2d3   :  { %670 = dma.vmem_to_hbm [thread:$0]  %s668_s1, 128, %s1090_s7, [#allocation3]   ;;  %v802_v61 = vpop.f32.mrf.mxu0 }
 0x2d4   :  { %846 = dma.done.wait [#allocation3], 128  }
 0x2d5   :  { %847 = vsyncadd [#allocation3], 4294967168 }
 0x2d6   :  { %674 = vsyncpa [#allocation3], 1 }

</bundles_post_ra>
